<compile_context>
chip_gen: v5e
topology: v5e:2x2
jax: 0.10.0
libtpu: 0.0.40
codegen_flags: <defaults>
</compile_context>

<pallas_src>
import jax
import jax.numpy as jnp
from jax.experimental import pallas as pl
from jax.experimental.pallas import tpu as pltpu

_LANES = 128
_CONTIG_TARGET_BYTES = 512 * 1024   # desired contiguous HBM run per DMA
_D1_UNROLL_CAP = 32                 # max in-kernel unrolled flip length


def _vmem_capacity_bytes():
    """Physical VMEM per TensorCore; conservative default if the query is unavailable."""
    try:
        return int(pltpu.get_tpu_info().vmem_capacity_bytes)
    except Exception:
        return 64 * 1024 * 1024     # assume the smallest (v7x per-TC)


def _largest_divisor_leq(n, cap, multiple_of=1):
    """Largest divisor d of n with d <= cap and d % multiple_of == 0, else None."""
    best = None
    for d in range(1, min(n, max(cap, 1)) + 1):
        if n % d == 0 and d % multiple_of == 0:
            best = d
    return best


def _choose_blocks(d0, d1, rows, lanes, itemsize, budget_bytes):
    """Pick (d0_tile, d1_tile, rows_tile) for block (d0_tile, d1_tile, rows_tile, lanes)."""
    sub_mult = 8 * max(1, 4 // itemsize)          # 8 f32 / 16 bf16 / 32 int8-fp8
    slab_bytes = rows * lanes * itemsize          # one (1, 1, rows, lanes) slice

    if slab_bytes > budget_bytes:
        # Huge per-slice slabs: tile the rows axis, flip purely via index_map.
        cap_rows = max(1, budget_bytes // (lanes * itemsize))
        rows_tile = _largest_divisor_leq(rows, cap_rows, multiple_of=sub_mult)
        if rows_tile is None:
            rows_tile = rows                      # rare fallback: full dim
        return 1, 1, rows_tile

    # Slab fits: grow the block along d1 first (consecutive d1 slices are contiguous
    # in HBM), then fold d0 with the remaining budget.
    if slab_bytes >= _CONTIG_TARGET_BYTES:
        d1_tile = 1                               # already contiguous enough; no in-kernel flip
    else:
        cap_d1 = min(_D1_UNROLL_CAP,
                     max(1, _CONTIG_TARGET_BYTES // slab_bytes),
                     max(1, budget_bytes // slab_bytes))
        d1_tile = _largest_divisor_leq(d1, cap_d1) or 1

    rem = max(1, budget_bytes // (d1_tile * slab_bytes))
    d0_tile = _largest_divisor_leq(d0, rem) or 1
    return d0_tile, d1_tile, rows


def _make_copy_flip_kernel(d1_tile):
    def kernel(flip_ref, x_ref, o_ref):
        if d1_tile == 1:
            # Block-level reversal is fully encoded in the input index_map.
            o_ref[...] = x_ref[...]
            return

        do_flip = flip_ref[0] != 0

        @pl.when(do_flip)
        def _():
            # Reverse the d1_tile slices inside the block (VMEM addressing only).
            for l in range(d1_tile):              # static unroll, capped at _D1_UNROLL_CAP
                o_ref[:, l] = x_ref[:, d1_tile - 1 - l]

        @pl.when(jnp.logical_not(do_flip))
        def _():
            o_ref[...] = x_ref[...]

    return kernel


def _flip_axis1_pallas(x4, flip_flag):
    """x4: (d0, d1, rows, 128).  Returns x4 reversed along axis 1 iff flip_flag != 0."""
    d0, d1, rows, lanes = x4.shape
    itemsize = jnp.dtype(x4.dtype).itemsize

    vmem_cap = _vmem_capacity_bytes()
    if vmem_cap >= 96 * 1024 * 1024:              # v5e / v6e: 128 MiB physical VMEM
        budget = 16 * 1024 * 1024
        vmem_limit = 80 * 1024 * 1024
    else:                                         # v7x: 64 MiB per TensorCore
        budget = 6 * 1024 * 1024
        vmem_limit = 40 * 1024 * 1024

    d0_tile, d1_tile, rows_tile = _choose_blocks(d0, d1, rows, lanes, itemsize, budget)
    block = (d0_tile, d1_tile, rows_tile, lanes)
    grid = (d0 // d0_tile, d1 // d1_tile, rows // rows_tile)
    n_j = d1 // d1_tile                           # number of d1 blocks

    def in_index_map(i, j, r, flip_ref):
        f = flip_ref[0]                           # 0 or 1 (SMEM scalar)
        src_j = f * (n_j - 1 - j) + (1 - f) * j   # mirrored block when flipping
        return (i, src_j, r, 0)

    def out_index_map(i, j, r, flip_ref):
        return (i, j, r, 0)

    return pl.pallas_call(
        _make_copy_flip_kernel(d1_tile),
        out_shape=jax.ShapeDtypeStruct(x4.shape, x4.dtype),
        grid_spec=pltpu.PrefetchScalarGridSpec(
            num_scalar_prefetch=1,
            grid=grid,
            in_specs=[pl.BlockSpec(block, in_index_map)],
            out_specs=pl.BlockSpec(block, out_index_map),
        ),
        compiler_params=pltpu.CompilerParams(
            dimension_semantics=("parallel", "parallel", "parallel"),
            vmem_limit_bytes=vmem_limit,
        ),
        cost_estimate=pl.CostEstimate(
            flops=0,
            transcendentals=0,
            bytes_accessed=2 * x4.size * itemsize,
        ),
    )(flip_flag, x4)


def random_vertical_flip(x, key, p=0.5):
    """Matches the module: if rand(1) < p -> torch.flip(x, dims=[1]) else x."""
    orig_shape = x.shape
    assert len(orig_shape) >= 3, "expected (C, D, H, W) or (N, C, D, H, W)"
    d0, d1 = orig_shape[0], orig_shape[1]
    R = 1
    for s in orig_shape[2:]:
        R *= s

    # Random decision, same semantics as `torch.rand(1) < p`.
    flip_flag = (jax.random.uniform(key, (1,)) < p).astype(jnp.int32)

    # Lane-dense view: flatten trailing dims and pad to a multiple of 128 so the
    # kernel always sees full (rows, 128) slabs (unmasked vst on all generations).
    R_pad = ((R + _LANES - 1) // _LANES) * _LANES
    x3 = x.reshape(d0, d1, R)
    if R_pad != R:
        x3 = jnp.pad(x3, ((0, 0), (0, 0), (0, R_pad - R)))
    rows = R_pad // _LANES
    x4 = x3.reshape(d0, d1, rows, _LANES)

    out4 = _flip_axis1_pallas(x4, flip_flag)

    out3 = out4.reshape(d0, d1, R_pad)
    if R_pad != R:
        out3 = out3[:, :, :R]
    return out3.reshape(orig_shape)


if __name__ == "__main__":
    key = jax.random.PRNGKey(0)
    k_data, k_flip = jax.random.split(key)

    # Small (C, D, H, W) volume, consistent with the module's forward.
    C, D, H, W = 4, 8, 16, 16
    x = jax.random.normal(k_data, (C, D, H, W), dtype=jnp.float32)

    # p = 1.0: flip branch always taken.
    y_flip = jax.block_until_ready(random_vertical_flip(x, k_flip, p=1.0))
    assert jnp.array_equal(y_flip, jnp.flip(x, axis=1)), "flip branch mismatch"

    # p = 0.0: identity branch.
    y_id = jax.block_until_ready(random_vertical_flip(x, k_flip, p=0.0))
    assert jnp.array_equal(y_id, x), "identity branch mismatch"

    # p = 0.5: match the module's randomized semantics exactly.
    p = 0.5
    y = jax.block_until_ready(random_vertical_flip(x, k_flip, p=p))
    flip_decision = bool(jax.random.uniform(k_flip, (1,))[0] < p)
    y_ref = jnp.flip(x, axis=1) if flip_decision else x
    assert y.shape == x.shape and y.dtype == x.dtype
    assert jnp.array_equal(y, y_ref), "mismatch vs reference flip"

    # 5-D (N, C, D, H, W) case also supported by the module (flip is still dims=[1]).
    x5 = jax.random.normal(k_data, (2, 4, 8, 16, 16), dtype=jnp.float32)
    y5 = jax.block_until_ready(random_vertical_flip(x5, k_flip, p=1.0))
    assert jnp.array_equal(y5, jnp.flip(x5, axis=1)), "5-D flip mismatch"

    # Non-128-divisible trailing dims + bf16: exercises the pad-to-lane-dense path.
    x_odd = jax.random.normal(k_data, (3, 5, 7, 9), dtype=jnp.bfloat16)
    y_odd = jax.block_until_ready(random_vertical_flip(x_odd, k_flip, p=1.0))
    assert jnp.array_equal(y_odd, jnp.flip(x_odd, axis=1)), "odd-shape flip mismatch"

    print("KERNEL_OK")
</pallas_src>

<mosaic_0001>
module attributes {stable_mosaic.version = 11 : i64} {
  func.func @kernel(%arg0: i32, %arg1: i32, %arg2: i32, %arg3: memref<1xi32, #tpu.memory_space<smem>>, %arg4: memref<4x8x2x128xf32, #tpu.memory_space<vmem>>, %arg5: memref<4x8x2x128xf32, #tpu.memory_space<vmem>>) attributes {dimension_semantics = [#tpu.dimension_semantics<parallel>, #tpu.dimension_semantics<parallel>, #tpu.dimension_semantics<parallel>], iteration_bounds = array<i64: 1, 1, 1>, scalar_prefetch = 1 : i64, scratch_operands = 0 : i64, tpu.core_type = #tpu.core_type<tc>, window_params = [{transform_indices = @transform_0, window_bounds = array<i64: 4, 8, 2, 128>}, {transform_indices = @transform_1, window_bounds = array<i64: 4, 8, 2, 128>}]} {
    %c0 = arith.constant 0 : index
    %0 = memref.load %arg3[%c0] : memref<1xi32, #tpu.memory_space<smem>>
    %c0_i32 = arith.constant 0 : i32
    %1 = arith.cmpi ne, %0, %c0_i32 : i32
    %2 = arith.extui %1 : i1 to i32
    %c0_i32_0 = arith.constant 0 : i32
    %3 = arith.cmpi ne, %2, %c0_i32_0 : i32
    scf.if %3 {
      %c0_2 = arith.constant 0 : index
      %c7 = arith.constant 7 : index
      %c0_3 = arith.constant 0 : index
      %c0_4 = arith.constant 0 : index
      %7 = vector.load %arg4[%c0_2, %c7, %c0_3, %c0_4] : memref<4x8x2x128xf32, #tpu.memory_space<vmem>>, vector<4x1x2x128xf32>
      %8 = vector.shape_cast %7 : vector<4x1x2x128xf32> to vector<4x2x128xf32>
      %c0_5 = arith.constant 0 : index
      %c0_6 = arith.constant 0 : index
      %c0_7 = arith.constant 0 : index
      %c0_8 = arith.constant 0 : index
      %9 = vector.load %arg5[%c0_5, %c0_6, %c0_7, %c0_8] : memref<4x8x2x128xf32, #tpu.memory_space<vmem>>, vector<4x1x2x128xf32>
      %10 = vector.shape_cast %9 : vector<4x1x2x128xf32> to vector<4x2x128xf32>
      %11 = vector.shape_cast %8 : vector<4x2x128xf32> to vector<4x1x2x128xf32>
      tpu.vector_store %arg5[%c0_5, %c0_6, %c0_7, %c0_8], %11 {strides = array<i32>} : memref<4x8x2x128xf32, #tpu.memory_space<vmem>>, vector<4x1x2x128xf32>,
      %c0_9 = arith.constant 0 : index
      %c6 = arith.constant 6 : index
      %c0_10 = arith.constant 0 : index
      %c0_11 = arith.constant 0 : index
      %12 = vector.load %arg4[%c0_9, %c6, %c0_10, %c0_11] : memref<4x8x2x128xf32, #tpu.memory_space<vmem>>, vector<4x1x2x128xf32>
      %13 = vector.shape_cast %12 : vector<4x1x2x128xf32> to vector<4x2x128xf32>
      %c0_12 = arith.constant 0 : index
      %c1 = arith.constant 1 : index
      %c0_13 = arith.constant 0 : index
      %c0_14 = arith.constant 0 : index
      %14 = vector.load %arg5[%c0_12, %c1, %c0_13, %c0_14] : memref<4x8x2x128xf32, #tpu.memory_space<vmem>>, vector<4x1x2x128xf32>
      %15 = vector.shape_cast %14 : vector<4x1x2x128xf32> to vector<4x2x128xf32>
      %16 = vector.shape_cast %13 : vector<4x2x128xf32> to vector<4x1x2x128xf32>
      tpu.vector_store %arg5[%c0_12, %c1, %c0_13, %c0_14], %16 {strides = array<i32>} : memref<4x8x2x128xf32, #tpu.memory_space<vmem>>, vector<4x1x2x128xf32>,
      %c0_15 = arith.constant 0 : index
      %c5 = arith.constant 5 : index
      %c0_16 = arith.constant 0 : index
      %c0_17 = arith.constant 0 : index
      %17 = vector.load %arg4[%c0_15, %c5, %c0_16, %c0_17] : memref<4x8x2x128xf32, #tpu.memory_space<vmem>>, vector<4x1x2x128xf32>
      %18 = vector.shape_cast %17 : vector<4x1x2x128xf32> to vector<4x2x128xf32>
      %c0_18 = arith.constant 0 : index
      %c2 = arith.constant 2 : index
      %c0_19 = arith.constant 0 : index
      %c0_20 = arith.constant 0 : index
      %19 = vector.load %arg5[%c0_18, %c2, %c0_19, %c0_20] : memref<4x8x2x128xf32, #tpu.memory_space<vmem>>, vector<4x1x2x128xf32>
      %20 = vector.shape_cast %19 : vector<4x1x2x128xf32> to vector<4x2x128xf32>
      %21 = vector.shape_cast %18 : vector<4x2x128xf32> to vector<4x1x2x128xf32>
      tpu.vector_store %arg5[%c0_18, %c2, %c0_19, %c0_20], %21 {strides = array<i32>} : memref<4x8x2x128xf32, #tpu.memory_space<vmem>>, vector<4x1x2x128xf32>,
      %c0_21 = arith.constant 0 : index
      %c4 = arith.constant 4 : index
      %c0_22 = arith.constant 0 : index
      %c0_23 = arith.constant 0 : index
      %22 = vector.load %arg4[%c0_21, %c4, %c0_22, %c0_23] : memref<4x8x2x128xf32, #tpu.memory_space<vmem>>, vector<4x1x2x128xf32>
      %23 = vector.shape_cast %22 : vector<4x1x2x128xf32> to vector<4x2x128xf32>
      %c0_24 = arith.constant 0 : index
      %c3 = arith.constant 3 : index
      %c0_25 = arith.constant 0 : index
      %c0_26 = arith.constant 0 : index
      %24 = vector.load %arg5[%c0_24, %c3, %c0_25, %c0_26] : memref<4x8x2x128xf32, #tpu.memory_space<vmem>>, vector<4x1x2x128xf32>
      %25 = vector.shape_cast %24 : vector<4x1x2x128xf32> to vector<4x2x128xf32>
      %26 = vector.shape_cast %23 : vector<4x2x128xf32> to vector<4x1x2x128xf32>
      tpu.vector_store %arg5[%c0_24, %c3, %c0_25, %c0_26], %26 {strides = array<i32>} : memref<4x8x2x128xf32, #tpu.memory_space<vmem>>, vector<4x1x2x128xf32>,
      %c0_27 = arith.constant 0 : index
      %c3_28 = arith.constant 3 : index
      %c0_29 = arith.constant 0 : index
      %c0_30 = arith.constant 0 : index
      %27 = vector.load %arg4[%c0_27, %c3_28, %c0_29, %c0_30] : memref<4x8x2x128xf32, #tpu.memory_space<vmem>>, vector<4x1x2x128xf32>
      %28 = vector.shape_cast %27 : vector<4x1x2x128xf32> to vector<4x2x128xf32>
      %c0_31 = arith.constant 0 : index
      %c4_32 = arith.constant 4 : index
      %c0_33 = arith.constant 0 : index
      %c0_34 = arith.constant 0 : index
      %29 = vector.load %arg5[%c0_31, %c4_32, %c0_33, %c0_34] : memref<4x8x2x128xf32, #tpu.memory_space<vmem>>, vector<4x1x2x128xf32>
      %30 = vector.shape_cast %29 : vector<4x1x2x128xf32> to vector<4x2x128xf32>
      %31 = vector.shape_cast %28 : vector<4x2x128xf32> to vector<4x1x2x128xf32>
      tpu.vector_store %arg5[%c0_31, %c4_32, %c0_33, %c0_34], %31 {strides = array<i32>} : memref<4x8x2x128xf32, #tpu.memory_space<vmem>>, vector<4x1x2x128xf32>,
      %c0_35 = arith.constant 0 : index
      %c2_36 = arith.constant 2 : index
      %c0_37 = arith.constant 0 : index
      %c0_38 = arith.constant 0 : index
      %32 = vector.load %arg4[%c0_35, %c2_36, %c0_37, %c0_38] : memref<4x8x2x128xf32, #tpu.memory_space<vmem>>, vector<4x1x2x128xf32>
      %33 = vector.shape_cast %32 : vector<4x1x2x128xf32> to vector<4x2x128xf32>
      %c0_39 = arith.constant 0 : index
      %c5_40 = arith.constant 5 : index
      %c0_41 = arith.constant 0 : index
      %c0_42 = arith.constant 0 : index
      %34 = vector.load %arg5[%c0_39, %c5_40, %c0_41, %c0_42] : memref<4x8x2x128xf32, #tpu.memory_space<vmem>>, vector<4x1x2x128xf32>
      %35 = vector.shape_cast %34 : vector<4x1x2x128xf32> to vector<4x2x128xf32>
      %36 = vector.shape_cast %33 : vector<4x2x128xf32> to vector<4x1x2x128xf32>
      tpu.vector_store %arg5[%c0_39, %c5_40, %c0_41, %c0_42], %36 {strides = array<i32>} : memref<4x8x2x128xf32, #tpu.memory_space<vmem>>, vector<4x1x2x128xf32>,
      %c0_43 = arith.constant 0 : index
      %c1_44 = arith.constant 1 : index
      %c0_45 = arith.constant 0 : index
      %c0_46 = arith.constant 0 : index
      %37 = vector.load %arg4[%c0_43, %c1_44, %c0_45, %c0_46] : memref<4x8x2x128xf32, #tpu.memory_space<vmem>>, vector<4x1x2x128xf32>
      %38 = vector.shape_cast %37 : vector<4x1x2x128xf32> to vector<4x2x128xf32>
      %c0_47 = arith.constant 0 : index
      %c6_48 = arith.constant 6 : index
      %c0_49 = arith.constant 0 : index
      %c0_50 = arith.constant 0 : index
      %39 = vector.load %arg5[%c0_47, %c6_48, %c0_49, %c0_50] : memref<4x8x2x128xf32, #tpu.memory_space<vmem>>, vector<4x1x2x128xf32>
      %40 = vector.shape_cast %39 : vector<4x1x2x128xf32> to vector<4x2x128xf32>
      %41 = vector.shape_cast %38 : vector<4x2x128xf32> to vector<4x1x2x128xf32>
      tpu.vector_store %arg5[%c0_47, %c6_48, %c0_49, %c0_50], %41 {strides = array<i32>} : memref<4x8x2x128xf32, #tpu.memory_space<vmem>>, vector<4x1x2x128xf32>,
      %c0_51 = arith.constant 0 : index
      %c0_52 = arith.constant 0 : index
      %c0_53 = arith.constant 0 : index
      %c0_54 = arith.constant 0 : index
      %42 = vector.load %arg4[%c0_51, %c0_52, %c0_53, %c0_54] : memref<4x8x2x128xf32, #tpu.memory_space<vmem>>, vector<4x1x2x128xf32>
      %43 = vector.shape_cast %42 : vector<4x1x2x128xf32> to vector<4x2x128xf32>
      %c0_55 = arith.constant 0 : index
      %c7_56 = arith.constant 7 : index
      %c0_57 = arith.constant 0 : index
      %c0_58 = arith.constant 0 : index
      %44 = vector.load %arg5[%c0_55, %c7_56, %c0_57, %c0_58] : memref<4x8x2x128xf32, #tpu.memory_space<vmem>>, vector<4x1x2x128xf32>
      %45 = vector.shape_cast %44 : vector<4x1x2x128xf32> to vector<4x2x128xf32>
      %46 = vector.shape_cast %43 : vector<4x2x128xf32> to vector<4x1x2x128xf32>
      tpu.vector_store %arg5[%c0_55, %c7_56, %c0_57, %c0_58], %46 {strides = array<i32>} : memref<4x8x2x128xf32, #tpu.memory_space<vmem>>, vector<4x1x2x128xf32>,
    } else {
    }
    %true = arith.constant true
    %4 = arith.xori %1, %true : i1
    %5 = arith.extui %4 : i1 to i32
    %c0_i32_1 = arith.constant 0 : i32
    %6 = arith.cmpi ne, %5, %c0_i32_1 : i32
    scf.if %6 {
      %c0_2 = arith.constant 0 : index
      %c0_3 = arith.constant 0 : index
      %c0_4 = arith.constant 0 : index
      %c0_5 = arith.constant 0 : index
      %7 = vector.load %arg4[%c0_2, %c0_3, %c0_4, %c0_5] : memref<4x8x2x128xf32, #tpu.memory_space<vmem>>, vector<4x8x2x128xf32>
      %c0_6 = arith.constant 0 : index
      %c0_7 = arith.constant 0 : index
      %c0_8 = arith.constant 0 : index
      %c0_9 = arith.constant 0 : index
      %8 = vector.load %arg5[%c0_6, %c0_7, %c0_8, %c0_9] : memref<4x8x2x128xf32, #tpu.memory_space<vmem>>, vector<4x8x2x128xf32>
      tpu.vector_store %arg5[%c0_6, %c0_7, %c0_8, %c0_9], %7 {strides = array<i32>} : memref<4x8x2x128xf32, #tpu.memory_space<vmem>>, vector<4x8x2x128xf32>,
    } else {
    }
    return
  }
  func.func @transform_0(%arg0: i32, %arg1: i32, %arg2: i32, %arg3: memref<1xi32, #tpu.memory_space<smem>>) -> (i32, i32, i32, i32) {
    %c0 = arith.constant 0 : index
    %0 = memref.load %arg3[%c0] : memref<1xi32, #tpu.memory_space<smem>>
    %c0_i32 = arith.constant 0 : i32
    %1 = arith.subi %c0_i32, %arg1 : i32
    %2 = arith.muli %0, %1 : i32
    %c1_i32 = arith.constant 1 : i32
    %3 = arith.subi %c1_i32, %0 : i32
    %4 = arith.muli %3, %arg1 : i32
    %5 = arith.addi %2, %4 : i32
    %c0_i32_0 = arith.constant 0 : i32
    %c0_i32_1 = arith.constant 0 : i32
    return %arg0, %5, %arg2, %c0_i32_0 : i32, i32, i32, i32
  }
  func.func @transform_1(%arg0: i32, %arg1: i32, %arg2: i32, %arg3: memref<1xi32, #tpu.memory_space<smem>>) -> (i32, i32, i32, i32) {
    %c0_i32 = arith.constant 0 : i32
    %c0_i32_0 = arith.constant 0 : i32
    return %arg0, %arg1, %arg2, %c0_i32 : i32, i32, i32, i32
  }
}

</mosaic_0001>

<bundles_post_ra>
// kernel: tpu_custom_call.1
= control target key start
LH: loop header
LB: loop body
LE: loop exit
PB: predicated region body
PF: predicated region fallthrough
CT: control target
= control target key end

     0   :  { %8 = vsyncpa [#allocation5], 0  ;;  %s312_s0 = inlined_call_operand.<no memory space> [shape: s32[1], index: 0, kind: input, shape index: {}]   ;;  %s313_s1 = inlined_call_operand.hbm [shape: f32[4,8,2,128], index: 1, kind: input, shape index: {}]   ;;  %s314_s2 = inlined_call_operand.hbm [shape: f32[4,8,2,128], index: 2, kind: output, shape index: {}]  }
   0x1   :  { %9 = vsyncpa [#allocation6], 0  ;;  %s23_s11 = sshll.u32 %s313_s1, 4  ;;  %s275_s12 = smov [#allocation4]   ;;  %s24_s11 = int_to_ptr.hbm [resolvable:$true] %s23_s11 }
   0x2   :  { %s25_s13 = sshll.u32 %s275_s12, 4  ;;  %s276_s14 = smov 32   ;;  %s26_s13 = int_to_ptr.vmem [resolvable:$true] %s25_s13 }
   0x3   :  { %s277_s15 = smov 2  }
   0x4   :  { %31 = dma.hbm_to_vmem [thread:$0]  %s24_s11, 1024, %s26_s13, [#allocation5], %s276_s14, %s276_s14, %s277_s15  }
   0x5   :  { %271 = dma.done.wait [#allocation5], 1024  }
   0x6   :  { %272 = vsyncadd [#allocation5], 4294966272  ;;  %p217_p0 = scmp.eq.s32.totalorder %s312_s0, 0 }
   0x8   :  { %47 = sbr.rel (%p217_p0) target bundleno = 46 (0x2e), region = 13 }
   0xd   :  { %v49_v0 = vld [vmem:[#allocation4 + $0xe] sm:$0x3]  ;;  %v50_v1 = vld [vmem:[#allocation4 + $0x1e] sm:$0x3]  ;;  %v58_v4 = vld [vmem:[#allocation4 + $0xc] sm:$0x3] }
   0xe   :  { %v51_v2 = vld [vmem:[#allocation4 + $0x2e] sm:$0x3]  ;;  %53 = vst [vmem:[#allocation7] sm:$0x3] %v49_v0  ;;  %v52_v3 = vld [vmem:[#allocation4 + $0x3e] sm:$0x3] }
   0xf   :  { %54 = vst [vmem:[#allocation7 + $0x10] sm:$0x3] %v50_v1  ;;  %v59_v5 = vld [vmem:[#allocation4 + $0x1c] sm:$0x3]  ;;  %v60_v6 = vld [vmem:[#allocation4 + $0x2c] sm:$0x3] }
  0x10   :  { %55 = vst [vmem:[#allocation7 + $0x20] sm:$0x3] %v51_v2  ;;  %v61_v7 = vld [vmem:[#allocation4 + $0x3c] sm:$0x3]  ;;  %v68_v8 = vld [vmem:[#allocation4 + $0xa] sm:$0x3] }
  0x11   :  { %56 = vst [vmem:[#allocation7 + $0x30] sm:$0x3] %v52_v3  ;;  %v69_v9 = vld [vmem:[#allocation4 + $0x1a] sm:$0x3]  ;;  %v70_v10 = vld [vmem:[#allocation4 + $0x2a] sm:$0x3] }
  0x12   :  { %63 = vst [vmem:[#allocation7 + $0x2] sm:$0x3] %v58_v4  ;;  %v71_v11 = vld [vmem:[#allocation4 + $0x3a] sm:$0x3]  ;;  %v78_v12 = vld [vmem:[#allocation4 + $0x8] sm:$0x3] }
  0x13   :  { %64 = vst [vmem:[#allocation7 + $0x12] sm:$0x3] %v59_v5  ;;  %v79_v13 = vld [vmem:[#allocation4 + $0x18] sm:$0x3]  ;;  %v80_v14 = vld [vmem:[#allocation4 + $0x28] sm:$0x3] }
  0x14   :  { %65 = vst [vmem:[#allocation7 + $0x22] sm:$0x3] %v60_v6  ;;  %v81_v15 = vld [vmem:[#allocation4 + $0x38] sm:$0x3]  ;;  %v88_v16 = vld [vmem:[#allocation4 + $0x6] sm:$0x3] }
  0x15   :  { %66 = vst [vmem:[#allocation7 + $0x32] sm:$0x3] %v61_v7  ;;  %v89_v17 = vld [vmem:[#allocation4 + $0x16] sm:$0x3]  ;;  %v90_v18 = vld [vmem:[#allocation4 + $0x26] sm:$0x3] }
  0x16   :  { %73 = vst [vmem:[#allocation7 + $0x4] sm:$0x3] %v68_v8  ;;  %v91_v19 = vld [vmem:[#allocation4 + $0x36] sm:$0x3]  ;;  %v98_v20 = vld [vmem:[#allocation4 + $0x4] sm:$0x3] }
  0x17   :  { %74 = vst [vmem:[#allocation7 + $0x14] sm:$0x3] %v69_v9  ;;  %v99_v21 = vld [vmem:[#allocation4 + $0x14] sm:$0x3]  ;;  %v100_v22 = vld [vmem:[#allocation4 + $0x24] sm:$0x3] }
  0x18   :  { %75 = vst [vmem:[#allocation7 + $0x24] sm:$0x3] %v70_v10  ;;  %v101_v23 = vld [vmem:[#allocation4 + $0x34] sm:$0x3]  ;;  %v108_v24 = vld [vmem:[#allocation4 + $0x2] sm:$0x3] }
  0x19   :  { %76 = vst [vmem:[#allocation7 + $0x34] sm:$0x3] %v71_v11  ;;  %v109_v25 = vld [vmem:[#allocation4 + $0x12] sm:$0x3]  ;;  %v110_v26 = vld [vmem:[#allocation4 + $0x22] sm:$0x3] }
  0x1a   :  { %83 = vst [vmem:[#allocation7 + $0x6] sm:$0x3] %v78_v12  ;;  %v111_v27 = vld [vmem:[#allocation4 + $0x32] sm:$0x3]  ;;  %v117_v28 = vld [vmem:[#allocation4] sm:$0x3] }
  0x1b   :  { %84 = vst [vmem:[#allocation7 + $0x16] sm:$0x3] %v79_v13  ;;  %v118_v29 = vld [vmem:[#allocation4 + $0x10] sm:$0x3]  ;;  %v119_v30 = vld [vmem:[#allocation4 + $0x20] sm:$0x3] }
  0x1c   :  { %85 = vst [vmem:[#allocation7 + $0x26] sm:$0x3] %v80_v14  ;;  %v120_v31 = vld [vmem:[#allocation4 + $0x30] sm:$0x3] }
  0x1d   :  { %86 = vst [vmem:[#allocation7 + $0x36] sm:$0x3] %v81_v15 }
  0x1e   :  { %93 = vst [vmem:[#allocation7 + $0x8] sm:$0x3] %v88_v16 }
  0x1f   :  { %94 = vst [vmem:[#allocation7 + $0x18] sm:$0x3] %v89_v17 }
  0x20   :  { %95 = vst [vmem:[#allocation7 + $0x28] sm:$0x3] %v90_v18 }
  0x21   :  { %96 = vst [vmem:[#allocation7 + $0x38] sm:$0x3] %v91_v19 }
  0x22   :  { %103 = vst [vmem:[#allocation7 + $0xa] sm:$0x3] %v98_v20 }
  0x23   :  { %104 = vst [vmem:[#allocation7 + $0x1a] sm:$0x3] %v99_v21 }
  0x24   :  { %105 = vst [vmem:[#allocation7 + $0x2a] sm:$0x3] %v100_v22 }
  0x25   :  { %106 = vst [vmem:[#allocation7 + $0x3a] sm:$0x3] %v101_v23 }
  0x26   :  { %113 = vst [vmem:[#allocation7 + $0xc] sm:$0x3] %v108_v24 }
  0x27   :  { %114 = vst [vmem:[#allocation7 + $0x1c] sm:$0x3] %v109_v25 }
  0x28   :  { %115 = vst [vmem:[#allocation7 + $0x2c] sm:$0x3] %v110_v26 }
  0x29   :  { %116 = vst [vmem:[#allocation7 + $0x3c] sm:$0x3] %v111_v27 }
  0x2a   :  { %122 = vst [vmem:[#allocation7 + $0xe] sm:$0x3] %v117_v28 }
  0x2b   :  { %123 = vst [vmem:[#allocation7 + $0x1e] sm:$0x3] %v118_v29 }
  0x2c   :  { %124 = vst [vmem:[#allocation7 + $0x2e] sm:$0x3] %v119_v30 }
  0x2d   :  { %125 = vst [vmem:[#allocation7 + $0x3e] sm:$0x3] %v120_v31 }
  0x2e PF:  { %p218_p1 = scmp.ne.s32.totalorder %s312_s0, 0 }
  0x30   :  { %129 = sbr.rel (%p218_p1) target bundleno = 62 (0x3e), region = 17 }
  0x35   :  { %v130_v32 = vld [vmem:[#allocation4] sm:$0xff]   ;;  %v134_v33 = vld [vmem:[#allocation4 + $0x8] sm:$0xff]   ;;  %v138_v34 = vld [vmem:[#allocation4 + $0x10] sm:$0xff]  }
  0x36   :  { %162 = vst [vmem:[#allocation7] sm:$0xff] %v130_v32   ;;  %v142_v35 = vld [vmem:[#allocation4 + $0x18] sm:$0xff]   ;;  %v146_v36 = vld [vmem:[#allocation4 + $0x20] sm:$0xff]   ;;  %v150_v37 = vld [vmem:[#allocation4 + $0x28] sm:$0xff]  }
  0x37   :  { %166 = vst [vmem:[#allocation7 + $0x8] sm:$0xff] %v134_v33   ;;  %v154_v38 = vld [vmem:[#allocation4 + $0x30] sm:$0xff]   ;;  %v158_v39 = vld [vmem:[#allocation4 + $0x38] sm:$0xff]  }
  0x38   :  { %170 = vst [vmem:[#allocation7 + $0x10] sm:$0xff] %v138_v34  }
  0x39   :  { %174 = vst [vmem:[#allocation7 + $0x18] sm:$0xff] %v142_v35  }
  0x3a   :  { %178 = vst [vmem:[#allocation7 + $0x20] sm:$0xff] %v146_v36  }
  0x3b   :  { %182 = vst [vmem:[#allocation7 + $0x28] sm:$0xff] %v150_v37  }
  0x3c   :  { %186 = vst [vmem:[#allocation7 + $0x30] sm:$0xff] %v154_v38  }
  0x3d   :  { %190 = vst [vmem:[#allocation7 + $0x38] sm:$0xff] %v158_v39  }
  0x3e PF:  { %s200_s20 = sshll.u32 %s314_s2, 4  ;;  %s278_s21 = smov [#allocation7]   ;;  %s201_s20 = int_to_ptr.hbm [resolvable:$true] %s200_s20 }
  0x3f   :  { %s198_s22 = sshll.u32 %s278_s21, 4  ;;  %s199_s22 = int_to_ptr.vmem [resolvable:$true] %s198_s22 }
  0x40   :  { %206 = dma.vmem_to_hbm [thread:$0]  %s199_s22, 1024, %s201_s20, [#allocation6], %s276_s14, %s276_s14, %s277_s15  }
  0x41   :  { %273 = dma.done.wait [#allocation6], 1024  }
  0x42   :  { %274 = vsyncadd [#allocation6], 4294966272 }
  0x43   :  { %211 = vsyncpa [#allocation5], 1 }
  0x44   :  { %212 = vsyncpa [#allocation6], 1 }

</bundles_post_ra>
